<compile_context>
chip_gen: v7x
topology: tpu7x:2x2x1
jax: 0.10.0
libtpu: 0.0.40
codegen_flags: <defaults>
</compile_context>

<pallas_src>
import functools

import jax
import jax.numpy as jnp
from jax import lax
from jax.experimental import pallas as pl
from jax.experimental.pallas import tpu as pltpu


def classify_kernel(ids_ref, inv_len_ref, params_ref, out_ref, *, vp):
    """Single-step kernel; every operand is fully VMEM resident.

    params_ref row layout (lane dim = layer_width LW, sections 8-row aligned):
      [0         : vp        )  E1a = emb @ w1[:, :E].T   (vocab rows, zero-padded)
      [vp        : 2*vp      )  E1b = emb @ w1[:, E:].T
      [2*vp      : 2*vp+LW   )  w2.T                       (LW, LW)
      [2*vp+LW   : +8        )  biases: row0=b1, row1=b2, row2=b3 (first C lanes)
      [2*vp+LW+8 : +8        )  final.weight rows (C, LW), zero-padded to 8 rows
    """
    _, B, S = ids_ref.shape
    lw = params_ref.shape[1]
    C = out_ref.shape[1]

    e1a = params_ref[0:vp, :]                               # (Vp, LW)
    e1b = params_ref[vp:2 * vp, :]                          # (Vp, LW)
    w2 = params_ref[2 * vp:2 * vp + lw, :]                  # (LW, LW)
    boff = 2 * vp + lw
    bias_blk = params_ref[boff:boff + 8, :]                 # (8, LW)
    w3_blk = params_ref[boff + 8:boff + 16, :]              # (8, LW), rows >= C are 0

    inv_len = inv_len_ref[...]                              # (2, B, 1)
    v_iota = lax.broadcasted_iota(jnp.int32, (B, S, vp), 2)

    def scaled_counts(i):
        # Bag-of-words counts scaled by 1/len: one 3-D compare + a sublane
        # (XLU) reduce instead of a serial 15-deep add chain per sentence.
        ids_i = ids_ref[i]                                  # (B, S) int32
        onehot = (ids_i[:, :, None] == v_iota).astype(jnp.float32)   # (B, S, Vp)
        counts = jnp.sum(onehot, axis=1)                    # (B, Vp)
        return counts * inv_len[i]                          # fold 1/len (1 VALU op)

    # Layer 1 is pre-folded into the embedding table:
    #   pooled_i @ w1_half_i.T == scaled_counts_i @ E1_i
    h1 = (jnp.dot(scaled_counts(0), e1a, preferred_element_type=jnp.float32)
          + jnp.dot(scaled_counts(1), e1b, preferred_element_type=jnp.float32)
          + bias_blk[0:1, :])
    h1 = jnp.maximum(h1, 0.0)        # relu; dropout d1 is identity in eval mode

    h2 = jnp.dot(h1, w2, preferred_element_type=jnp.float32) + bias_blk[1:2, :]
    h2 = jnp.maximum(h2, 0.0)        # relu; dropout d2 is identity in eval mode

    # Final layer: contract over LW against final.weight kept in its native
    # (C, LW) row layout (no lane padding of the tiny C-wide output).
    logits_full = lax.dot_general(h2, w3_blk, (((1,), (1,)), ((), ())),
                                  preferred_element_type=jnp.float32)   # (B, 8)
    logits = logits_full[:, :C] + bias_blk[2:3, :C]                     # (B, C)

    # log_softmax over the class axis (dim=1)
    m = jnp.max(logits, axis=1, keepdims=True)
    shifted = logits - m
    lse = jnp.log(jnp.sum(jnp.exp(shifted), axis=1, keepdims=True))
    out_ref[...] = shifted - lse


def prepare_params(params):
    """One-time parameter re-layout / pre-fold (call once, NOT per forward).

    * Re-zeroes embedding row 0 (padding_idx) so pad tokens cannot leak in.
    * Pre-folds layer 1 into the embedding table (drops one MXU pass and the
      lane-axis concat from the hot path).
    * Packs everything into ONE lane-128 f32 slab -> 3 operands per call.
    """
    emb = params["embedding"].astype(jnp.float32)
    emb = emb.at[0].set(0.0)                                # enforce padding row
    V, E = emb.shape
    w1 = params["w1"].astype(jnp.float32)                   # (LW, 2E), torch (out,in)
    LW = w1.shape[0]
    C = params["w3"].shape[0]
    Vp = ((V + 7) // 8) * 8                                 # 8-sublane aligned sections

    e1a = emb @ w1[:, :E].T                                 # (V, LW)
    e1b = emb @ w1[:, E:].T                                 # (V, LW)

    n_rows = 2 * Vp + LW + 16
    slab = jnp.zeros((n_rows, LW), jnp.float32)
    slab = slab.at[0:V, :].set(e1a)
    slab = slab.at[Vp:Vp + V, :].set(e1b)
    slab = slab.at[2 * Vp:2 * Vp + LW, :].set(params["w2"].astype(jnp.float32).T)
    boff = 2 * Vp + LW
    slab = slab.at[boff + 0, :].set(params["b1"].astype(jnp.float32))
    slab = slab.at[boff + 1, :].set(params["b2"].astype(jnp.float32))
    slab = slab.at[boff + 2, :C].set(params["b3"].astype(jnp.float32))
    slab = slab.at[boff + 8:boff + 8 + C, :].set(params["w3"].astype(jnp.float32))
    return slab


def classify_sentence_forward(slab, sentences, sent_lengths, *, num_classes):
    """slab: prepare_params output. sentences: (2, B, S) int token ids.
    sent_lengths: (2, B), values > 0 (precondition of the data pipeline)."""
    _, B, S = sentences.shape
    LW = slab.shape[1]
    Vp = (slab.shape[0] - LW - 16) // 2                     # inverse of the slab layout

    ids = sentences.astype(jnp.int32)
    # Exact divide replaced by a multiply: reciprocal is 2*B scalars computed
    # once here, well inside the 1e-5 tolerance.
    inv_lens = (1.0 / sent_lengths.astype(jnp.float32))[..., None]      # (2, B, 1)

    kernel = functools.partial(classify_kernel, vp=Vp)
    return pl.pallas_call(
        kernel,
        out_shape=jax.ShapeDtypeStruct((B, num_classes), jnp.float32),
        grid=(1,),
        in_specs=[pl.BlockSpec(ids.shape, lambda i: (0, 0, 0)),
                  pl.BlockSpec(inv_lens.shape, lambda i: (0, 0, 0)),
                  pl.BlockSpec(slab.shape, lambda i: (0, 0))],
        out_specs=pl.BlockSpec((B, num_classes), lambda i: (0, 0)),
        compiler_params=pltpu.CompilerParams(
            dimension_semantics=("arbitrary",)),
    )(ids, inv_lens, slab)
    # TODO(synk): if the batch grows beyond toy scale, add a leading grid axis
    # over B with dimension_semantics=("parallel",) and >=128-row B-blocks so
    # v7x's second TensorCore is used; size blocks against v7x's 64 MiB VMEM.


def reference_forward(params, sentences, sent_lengths):
    """Pure-JAX reference mirroring the PyTorch forward (eval mode)."""
    emb = params["embedding"]
    pooled = []
    for i in range(2):
        e = jnp.take(emb, sentences[i], axis=0)
        pooled.append(jnp.sum(e, axis=1) / sent_lengths[i].reshape(-1, 1))
    x = jnp.concatenate(pooled, axis=1)
    h1 = jax.nn.relu(x @ params["w1"].T + params["b1"])
    h2 = jax.nn.relu(h1 @ params["w2"].T + params["b2"])
    return jax.nn.log_softmax(h2 @ params["w3"].T + params["b3"], axis=1)


if __name__ == "__main__":
    # Small shapes consistent with the module
    VOCAB = 50
    EMB = 32
    NUM_CLASSES = 3
    LAYER_WIDTH = 128
    BATCH = 8
    SEQ = 16

    key = jax.random.PRNGKey(0)
    k = jax.random.split(key, 10)

    # Deterministic parameter init (synthetic; stands in for word2vec load).
    embedding = 0.1 * jax.random.normal(k[0], (VOCAB, EMB), jnp.float32)
    embedding = embedding.at[0].set(0.0)        # padding_idx=0 row is zero
    params = {
        "embedding": embedding,
        "w1": 0.05 * jax.random.normal(k[1], (LAYER_WIDTH, 2 * EMB), jnp.float32),
        "b1": 0.01 * jax.random.normal(k[2], (LAYER_WIDTH,), jnp.float32),
        "w2": 0.05 * jax.random.normal(k[3], (LAYER_WIDTH, LAYER_WIDTH), jnp.float32),
        "b2": 0.01 * jax.random.normal(k[4], (LAYER_WIDTH,), jnp.float32),
        "w3": 0.05 * jax.random.normal(k[5], (NUM_CLASSES, LAYER_WIDTH), jnp.float32),
        "b3": 0.01 * jax.random.normal(k[6], (NUM_CLASSES,), jnp.float32),
    }
    # TODO(synk): dropout layers (d1, d2) are treated as identity (eval mode).

    # Synthetic token ids: positions >= sentence length are padded with id 0.
    sentences = jax.random.randint(k[7], (2, BATCH, SEQ), 1, VOCAB, jnp.int32)
    sent_lengths = jax.random.randint(k[8], (2, BATCH), 3, SEQ + 1, jnp.int32)
    pos = jnp.arange(SEQ)[None, None, :]
    sentences = jnp.where(pos < sent_lengths[..., None], sentences, 0)
    sent_lengths_f = sent_lengths.astype(jnp.float32)

    slab = prepare_params(params)               # one-time weight re-layout / fold
    fwd = jax.jit(classify_sentence_forward, static_argnames=("num_classes",))
    out = fwd(slab, sentences, sent_lengths_f, num_classes=NUM_CLASSES)
    out = jax.block_until_ready(out)

    ref = reference_forward(params, sentences, sent_lengths_f)
    assert out.shape == (BATCH, NUM_CLASSES)
    assert jnp.allclose(out, ref, atol=1e-5, rtol=1e-5)

    print("KERNEL_OK")
</pallas_src>

<mosaic_0001>
module attributes {stable_mosaic.version = 11 : i64} {
  func.func @classify_kernel(%arg0: i32, %arg1: memref<2x8x16xi32, #tpu.memory_space<vmem>>, %arg2: memref<2x8x1xf32, #tpu.memory_space<vmem>>, %arg3: memref<256x128xf32, #tpu.memory_space<vmem>>, %arg4: memref<8x3xf32, #tpu.memory_space<vmem>>) attributes {dimension_semantics = [#tpu.dimension_semantics<arbitrary>], iteration_bounds = array<i64: 1>, scalar_prefetch = 0 : i64, scratch_operands = 0 : i64, tpu.core_type = #tpu.core_type<tc>, window_params = [{pipeline_mode = #tpu.pipeline_mode<synchronous>, transform_indices = @transform_0, window_bounds = array<i64: 2, 8, 16>}, {pipeline_mode = #tpu.pipeline_mode<synchronous>, transform_indices = @transform_1, window_bounds = array<i64: 2, 8, 1>}, {pipeline_mode = #tpu.pipeline_mode<synchronous>, transform_indices = @transform_2, window_bounds = array<i64: 256, 128>}, {pipeline_mode = #tpu.pipeline_mode<synchronous>, transform_indices = @transform_3, window_bounds = array<i64: 8, 3>}]} {
    %c0 = arith.constant 0 : index
    %c0_0 = arith.constant 0 : index
    %0 = vector.load %arg3[%c0, %c0_0] : memref<256x128xf32, #tpu.memory_space<vmem>>, vector<56x128xf32>
    %c56 = arith.constant 56 : index
    %c0_1 = arith.constant 0 : index
    %1 = vector.load %arg3[%c56, %c0_1] : memref<256x128xf32, #tpu.memory_space<vmem>>, vector<56x128xf32>
    %c112 = arith.constant 112 : index
    %c0_2 = arith.constant 0 : index
    %2 = vector.load %arg3[%c112, %c0_2] : memref<256x128xf32, #tpu.memory_space<vmem>>, vector<128x128xf32>
    %c240 = arith.constant 240 : index
    %c0_3 = arith.constant 0 : index
    %3 = vector.load %arg3[%c240, %c0_3] : memref<256x128xf32, #tpu.memory_space<vmem>>, vector<8x128xf32>
    %c248 = arith.constant 248 : index
    %c0_4 = arith.constant 0 : index
    %4 = vector.load %arg3[%c248, %c0_4] : memref<256x128xf32, #tpu.memory_space<vmem>>, vector<8x128xf32>
    %c0_5 = arith.constant 0 : index
    %c0_6 = arith.constant 0 : index
    %c0_7 = arith.constant 0 : index
    %5 = vector.load %arg2[%c0_5, %c0_6, %c0_7] : memref<2x8x1xf32, #tpu.memory_space<vmem>>, vector<2x8x1xf32>
    %6 = tpu.iota {dimensions = array<i32: 2>} : vector<8x16x56xi32>
    %c0_8 = arith.constant 0 : index
    %c0_9 = arith.constant 0 : index
    %c0_10 = arith.constant 0 : index
    %7 = vector.load %arg1[%c0_8, %c0_9, %c0_10] : memref<2x8x16xi32, #tpu.memory_space<vmem>>, vector<1x8x16xi32>
    %8 = vector.shape_cast %7 : vector<1x8x16xi32> to vector<8x16xi32>
    %9 = vector.shape_cast %8 : vector<8x16xi32> to vector<8x16x1xi32>
    %10 = vector.broadcast %9 : vector<8x16x1xi32> to vector<8x16x56xi32>
    %11 = arith.cmpi eq, %10, %6 : vector<8x16x56xi32>
    %12 = arith.extui %11 : vector<8x16x56xi1> to vector<8x16x56xi32>
    %13 = arith.sitofp %12 : vector<8x16x56xi32> to vector<8x16x56xf32>
    %cst = arith.constant dense<0.000000e+00> : vector<8x56xf32>
    %14 = vector.multi_reduction <add>, %13, %cst [1] : vector<8x16x56xf32> to vector<8x56xf32>
    %15 = vector.extract_strided_slice %5 {offsets = [0, 0, 0], sizes = [1, 8, 1], strides = [1, 1, 1]} : vector<2x8x1xf32> to vector<1x8x1xf32>
    %16 = vector.shape_cast %15 : vector<1x8x1xf32> to vector<8x1xf32>
    %17 = vector.broadcast %16 : vector<8x1xf32> to vector<8x56xf32>
    %18 = arith.mulf %14, %17 : vector<8x56xf32>
    %cst_11 = arith.constant dense<0.000000e+00> : vector<8x128xf32>
    %19 = tpu.matmul %18, %0, %cst_11 {dimension_numbers = #tpu.dot_dimension_numbers<[1], [0], [0], [1], [0, 0, 1, 1], [], []>} : vector<8x56xf32>, vector<56x128xf32>, vector<8x128xf32> -> vector<8x128xf32>
    %c1 = arith.constant 1 : index
    %c0_12 = arith.constant 0 : index
    %c0_13 = arith.constant 0 : index
    %20 = vector.load %arg1[%c1, %c0_12, %c0_13] : memref<2x8x16xi32, #tpu.memory_space<vmem>>, vector<1x8x16xi32>
    %21 = vector.shape_cast %20 : vector<1x8x16xi32> to vector<8x16xi32>
    %22 = vector.shape_cast %21 : vector<8x16xi32> to vector<8x16x1xi32>
    %23 = vector.broadcast %22 : vector<8x16x1xi32> to vector<8x16x56xi32>
    %24 = arith.cmpi eq, %23, %6 : vector<8x16x56xi32>
    %25 = arith.extui %24 : vector<8x16x56xi1> to vector<8x16x56xi32>
    %26 = arith.sitofp %25 : vector<8x16x56xi32> to vector<8x16x56xf32>
    %cst_14 = arith.constant dense<0.000000e+00> : vector<8x56xf32>
    %27 = vector.multi_reduction <add>, %26, %cst_14 [1] : vector<8x16x56xf32> to vector<8x56xf32>
    %28 = vector.extract_strided_slice %5 {offsets = [1, 0, 0], sizes = [1, 8, 1], strides = [1, 1, 1]} : vector<2x8x1xf32> to vector<1x8x1xf32>
    %29 = vector.shape_cast %28 : vector<1x8x1xf32> to vector<8x1xf32>
    %30 = vector.broadcast %29 : vector<8x1xf32> to vector<8x56xf32>
    %31 = arith.mulf %27, %30 : vector<8x56xf32>
    %cst_15 = arith.constant dense<0.000000e+00> : vector<8x128xf32>
    %32 = tpu.matmul %31, %1, %cst_15 {dimension_numbers = #tpu.dot_dimension_numbers<[1], [0], [0], [1], [0, 0, 1, 1], [], []>} : vector<8x56xf32>, vector<56x128xf32>, vector<8x128xf32> -> vector<8x128xf32>
    %33 = arith.addf %19, %32 : vector<8x128xf32>
    %34 = vector.extract_strided_slice %3 {offsets = [0, 0], sizes = [1, 128], strides = [1, 1]} : vector<8x128xf32> to vector<1x128xf32>
    %35 = vector.broadcast %34 : vector<1x128xf32> to vector<8x128xf32>
    %36 = arith.addf %33, %35 : vector<8x128xf32>
    %cst_16 = arith.constant 0.000000e+00 : f32
    %37 = vector.broadcast %cst_16 : f32 to vector<8x128xf32>
    %38 = arith.maximumf %36, %37 : vector<8x128xf32>
    %cst_17 = arith.constant dense<0.000000e+00> : vector<8x128xf32>
    %39 = tpu.matmul %38, %2, %cst_17 {dimension_numbers = #tpu.dot_dimension_numbers<[1], [0], [0], [1], [0, 0, 1, 1], [], []>} : vector<8x128xf32>, vector<128x128xf32>, vector<8x128xf32> -> vector<8x128xf32>
    %40 = vector.extract_strided_slice %3 {offsets = [1, 0], sizes = [1, 128], strides = [1, 1]} : vector<8x128xf32> to vector<1x128xf32>
    %41 = vector.broadcast %40 : vector<1x128xf32> to vector<8x128xf32>
    %42 = arith.addf %39, %41 : vector<8x128xf32>
    %cst_18 = arith.constant 0.000000e+00 : f32
    %43 = vector.broadcast %cst_18 : f32 to vector<8x128xf32>
    %44 = arith.maximumf %42, %43 : vector<8x128xf32>
    %cst_19 = arith.constant dense<0.000000e+00> : vector<8x8xf32>
    %45 = tpu.matmul %44, %4, %cst_19 {dimension_numbers = #tpu.dot_dimension_numbers<[1], [1], [0], [0], [0, 0, 1, 0], [], []>} : vector<8x128xf32>, vector<8x128xf32>, vector<8x8xf32> -> vector<8x8xf32>
    %46 = vector.extract_strided_slice %45 {offsets = [0, 0], sizes = [8, 3], strides = [1, 1]} : vector<8x8xf32> to vector<8x3xf32>
    %47 = vector.extract_strided_slice %3 {offsets = [2, 0], sizes = [1, 3], strides = [1, 1]} : vector<8x128xf32> to vector<1x3xf32>
    %48 = vector.broadcast %47 : vector<1x3xf32> to vector<8x3xf32>
    %49 = arith.addf %46, %48 : vector<8x3xf32>
    %cst_20 = arith.constant dense<0xFF800000> : vector<8xf32>
    %50 = vector.multi_reduction <maximumf>, %49, %cst_20 [1] : vector<8x3xf32> to vector<8xf32>
    %51 = vector.shape_cast %50 : vector<8xf32> to vector<8x1xf32>
    %52 = vector.broadcast %51 : vector<8x1xf32> to vector<8x3xf32>
    %53 = arith.subf %49, %52 : vector<8x3xf32>
    %54 = math.exp %53 : vector<8x3xf32>
    %cst_21 = arith.constant dense<0.000000e+00> : vector<8xf32>
    %55 = vector.multi_reduction <add>, %54, %cst_21 [1] : vector<8x3xf32> to vector<8xf32>
    %56 = vector.shape_cast %55 : vector<8xf32> to vector<8x1xf32>
    %57 = math.log %56 : vector<8x1xf32>
    %58 = vector.broadcast %57 : vector<8x1xf32> to vector<8x3xf32>
    %59 = arith.subf %53, %58 : vector<8x3xf32>
    %c0_22 = arith.constant 0 : index
    %c0_23 = arith.constant 0 : index
    %60 = vector.load %arg4[%c0_22, %c0_23] : memref<8x3xf32, #tpu.memory_space<vmem>>, vector<8x3xf32>
    tpu.vector_store %arg4[%c0_22, %c0_23], %59 {strides = array<i32>} : memref<8x3xf32, #tpu.memory_space<vmem>>, vector<8x3xf32>,
    return
  }
  func.func @transform_0(%arg0: i32) -> (i32, i32, i32) {
    %c0_i32 = arith.constant 0 : i32
    %c0_i32_0 = arith.constant 0 : i32
    %c0_i32_1 = arith.constant 0 : i32
    %c0_i32_2 = arith.constant 0 : i32
    return %c0_i32, %c0_i32_0, %c0_i32_1 : i32, i32, i32
  }
  func.func @transform_1(%arg0: i32) -> (i32, i32, i32) {
    %c0_i32 = arith.constant 0 : i32
    %c0_i32_0 = arith.constant 0 : i32
    %c0_i32_1 = arith.constant 0 : i32
    %c0_i32_2 = arith.constant 0 : i32
    return %c0_i32, %c0_i32_0, %c0_i32_1 : i32, i32, i32
  }
  func.func @transform_2(%arg0: i32) -> (i32, i32) {
    %c0_i32 = arith.constant 0 : i32
    %c0_i32_0 = arith.constant 0 : i32
    %c0_i32_1 = arith.constant 0 : i32
    return %c0_i32, %c0_i32_0 : i32, i32
  }
  func.func @transform_3(%arg0: i32) -> (i32, i32) {
    %c0_i32 = arith.constant 0 : i32
    %c0_i32_0 = arith.constant 0 : i32
    %c0_i32_1 = arith.constant 0 : i32
    return %c0_i32, %c0_i32_0 : i32, i32
  }
}

</mosaic_0001>

<bundles_post_ra>
// kernel: classify_sentence_forward.1
= control target key start
LH: loop header
LB: loop body
LE: loop exit
PB: predicated region body
PF: predicated region fallthrough
CT: control target
= control target key end

     0   :  { %8 = vsyncpa [#allocation3], 0  ;;  %s1130_s12 = smov [#allocation2]   ;;  %s1372_s0 = inlined_call_operand.vmem [shape: s32[2,8,16], index: 0, kind: input, shape index: {}]   ;;  %s1373_s1 = inlined_call_operand.vmem [shape: f32[2,8,1], index: 1, kind: input, shape index: {}]   ;;  %s1374_s2 = inlined_call_operand.hbm [shape: f32[256,128], index: 2, kind: input, shape index: {}]   ;;  %s1375_s3 = inlined_call_operand.vmem [shape: f32[8,3], index: 3, kind: output, shape index: {}]  }
   0x1   :  { %s18_s13 = sshll.u32 %s1130_s12, 4  ;;  %s1106_s16 = scalar_lea.hbm %s1374_s2, 4096  ;;  %s19_s13 = int_to_ptr.vmem [resolvable:$true] %s18_s13 }
   0x2   :  { %p1107_p0 = scmp.ne.s32.totalorder %s1374_s2, %s1106_s16  ;;  %p1110_p1 = scmp.lt.u32.totalorder %s1106_s16, %s1374_s2 }
   0x4   :  { %p1112_p2 = pnand %p1110_p1, %p1107_p0 }
   0x6   :  { %1115 = shalt.err (!%p1112_p2)
}
   0x7   :  { %s1116_s21 = scalar_lea.vmem %s19_s13, 4096  ;;  %p1121_p4 = scmp.lt.s32.totalorder %s19_s13, %s19_s13 }
   0x8   :  { %p1117_p3 = scmp.ne.s32.totalorder %s19_s13, %s1116_s21  ;;  %p1122_p5 = scmp.lt.s32.totalorder %s1116_s21, %s1116_s21 }
   0xa   :  { %p1123_p6 = por %p1122_p5, %p1121_p4 }
   0xc   :  { %p1124_p7 = pnand %p1123_p6, %p1117_p3 }
   0xe   :  { %1127 = shalt.err (!%p1124_p7)
}
   0xf   :  { %s1131_s22 = smov 128   ;;  %s1132_s23 = smov 8  }
  0x10   :  { %24 = dma.hbm_to_vmem [thread:$0]  %s1374_s2, 4096, %s19_s13, [#allocation3], %s1131_s22, %s1131_s22, %s1132_s23  }
  0x11   :  { %1128 = dma.done.wait [#allocation3], 4096  }
  0x12   :  { %1129 = vsyncadd [#allocation3], 4294963200  ;;  %v62_v0 = vlaneseq  ;;  %v1133_v1 = vmov 0   ;;  %v924_v5 = vld [vmem:[%s1372_s0 + $0x8] sm:$0xff]  ;;  %v64_v20 = vld [vmem:[%s1372_s0] sm:$0xff]  ;;  %v1134_v27 = vmov 0.0|0.0  }
  0x13   :  { %1101 = vset.pattern.permute.xlu0 %v1133_v1  ;;  %v61_v22 = vld [vmem:[%s1373_s1 + $0x8] sm:$0xff]  ;;  %v35_v23 = vld [vmem:[#allocation2 + $0x38] sm:$0xff]  ;;  %v36_v24 = vld [vmem:[#allocation2 + $0x40] sm:$0xff]  ;;  %1052 = vmatprep.subr.bf16.mxu1 %v1134_v27  ;;  %v1135_v36 = vmov 0.0   ;;  %vm1136_vm0 = vmmov 0   ;;  %vm201_vm9 = vcmask 457728  }
  0x14   :  { %v1170_v2 = vshrl.u32 %v62_v0, 7  ;;  %v1053_v25 = vpack.c.bf16 %v36_v24, %v35_v23  ;;  %1070 = vmatprep.subr.bf16.mxu0 %v1134_v27  ;;  %v37_v28 = vld [vmem:[#allocation2 + $0x48] sm:$0xff]  ;;  %v38_v29 = vld [vmem:[#allocation2 + $0x50] sm:$0xff]  ;;  %v39_v32 = vld [vmem:[#allocation2 + $0x58] sm:$0xff]  ;;  %992 = vmatprep.mubr.msk.f32.mxu1 %vm1136_vm0, %v1135_v36  ;;  %v1215_v47 = vand.u32 127, %v62_v0 }
  0x15   :  { %v1056_v30 = vpack.c.bf16 %v38_v29, %v37_v28  ;;  %v40_v33 = vld [vmem:[#allocation2 + $0x60] sm:$0xff]  ;;  %v41_v38 = vld [vmem:[#allocation2 + $0x68] sm:$0xff]  ;;  %1044 = vmatprep.mubr.msk.f32.mxu0 %vm1136_vm0, %v1135_v36 }
  0x16   :  { %v1173_v3 = vsub.s32 2, %v1170_v2  ;;  %v1176_v4 = vsub.s32 1, %v1170_v2  ;;  %v1184_v8 = vsub.s32 0, %v1170_v2  ;;  %v100_v10 = vsub.s32 3, %v1170_v2  ;;  %1054 = vmatpush3.bf16.msra.mxu1 %v1053_v25  ;;  %v60_v42 = vld [vmem:[%s1373_s1] sm:$0xff] }
  0x17   :  { %v111_v12 = vsub.s32 4, %v1170_v2  ;;  %v122_v14 = vsub.s32 5, %v1170_v2  ;;  %v133_v16 = vsub.s32 6, %v1170_v2  ;;  %v144_v18 = vsub.s32 7, %v1170_v2  ;;  %1055 = vmatprep.subr.bf16.mxu1 %v1134_v27 }
  0x18   :  { %v328_v6 = vrot.slane %v924_v5, %v1173_v3  ;;  %v317_v7 = vrot.slane %v924_v5, %v1176_v4  ;;  %v306_v9 = vrot.slane %v924_v5, %v1184_v8  ;;  %v339_v11 = vrot.slane %v924_v5, %v100_v10 }
  0x19   :  { %v350_v13 = vrot.slane %v924_v5, %v111_v12  ;;  %v361_v15 = vrot.slane %v924_v5, %v122_v14  ;;  %v372_v17 = vrot.slane %v924_v5, %v133_v16  ;;  %v383_v19 = vrot.slane %v924_v5, %v144_v18 }
  0x1a   :  { %330 = vbcast.lane.b32.xlu1 %v328_v6, 256  ;;  %319 = vbcast.lane.b32.xlu0 %v317_v7, 256  ;;  %v79_v21 = vrot.slane %v64_v20, %v1176_v4  ;;  %v90_v26 = vrot.slane %v64_v20, %v1173_v3  ;;  %v68_v31 = vrot.slane %v64_v20, %v1184_v8 }
  0x1b   :  { %1057 = vmatpush3.bf16.msra.mxu1 %v1056_v30  ;;  %v1059_v34 = vpack.c.bf16 %v40_v33, %v39_v32  ;;  %v101_v35 = vrot.slane %v64_v20, %v100_v10  ;;  %v112_v37 = vrot.slane %v64_v20, %v111_v12  ;;  %v123_v39 = vrot.slane %v64_v20, %v122_v14 }
  0x1c   :  { %1058 = vmatprep.subr.bf16.mxu1 %v1134_v27  ;;  %v134_v40 = vrot.slane %v64_v20, %v133_v16  ;;  %v145_v41 = vrot.slane %v64_v20, %v144_v18 }
  0x1e   :  { %334 = vbcast.lane.b32.xlu1 %v328_v6, 264  ;;  %323 = vbcast.lane.b32.xlu0 %v317_v7, 264 }
  0x1f   :  { %1060 = vmatpush3.bf16.msra.mxu1 %v1059_v34 }
  0x20   :  { %990 = vmatprep.subr.mxu1 %v1135_v36 }
  0x22   :  { %312 = vbcast.lane.b32.xlu1 %v306_v9, 264  ;;  %308 = vbcast.lane.b32.xlu0 %v306_v9, 256 }
  0x23   :  { %991 = vmatpush3.msra.mxu1 %v41_v38 }
  0x24   :  { %1061 = vmatprep.subr.bf16.mxu1 %v1134_v27 }
  0x26   :  { %345 = vbcast.lane.b32.xlu1 %v339_v11, 264  ;;  %341 = vbcast.lane.b32.xlu0 %v339_v11, 256 }
  0x2a   :  { %356 = vbcast.lane.b32.xlu1 %v350_v13, 264  ;;  %352 = vbcast.lane.b32.xlu0 %v350_v13, 256 }
  0x2e   :  { %367 = vbcast.lane.b32.xlu1 %v361_v15, 264  ;;  %363 = vbcast.lane.b32.xlu0 %v361_v15, 256 }
  0x32   :  { %378 = vbcast.lane.b32.xlu1 %v372_v17, 264  ;;  %374 = vbcast.lane.b32.xlu0 %v372_v17, 256 }
  0x36   :  { %389 = vbcast.lane.b32.xlu1 %v383_v19, 264  ;;  %385 = vbcast.lane.b32.xlu0 %v383_v19, 256 }
  0x3a   :  { %81 = vbcast.lane.b32.xlu1 %v79_v21, 256  ;;  %513 = vperm.xlu0 %1101, %v61_v22  }
  0x3e   :  { %85 = vbcast.lane.b32.xlu1 %v79_v21, 264  ;;  %92 = vbcast.lane.b32.xlu0 %v90_v26, 256 }
  0x42   :  { %70 = vbcast.lane.b32.xlu0 %v68_v31, 256  ;;  %96 = vbcast.lane.b32.xlu1 %v90_v26, 264 }
  0x46   :  { %103 = vbcast.lane.b32.xlu0 %v101_v35, 256  ;;  %74 = vbcast.lane.b32.xlu1 %v68_v31, 264 }
  0x4a   :  { %114 = vbcast.lane.b32.xlu0 %v112_v37, 256  ;;  %107 = vbcast.lane.b32.xlu1 %v101_v35, 264 }
  0x4e   :  { %125 = vbcast.lane.b32.xlu0 %v123_v39, 256  ;;  %118 = vbcast.lane.b32.xlu1 %v112_v37, 264 }
  0x52   :  { %136 = vbcast.lane.b32.xlu0 %v134_v40, 256  ;;  %129 = vbcast.lane.b32.xlu1 %v123_v39, 264 }
  0x56   :  { %147 = vbcast.lane.b32.xlu0 %v145_v41, 256  ;;  %140 = vbcast.lane.b32.xlu1 %v134_v40, 264 }
  0x5a   :  { %276 = vperm.xlu0 %1101, %v60_v42   ;;  %151 = vbcast.lane.b32.xlu1 %v145_v41, 264 }
  0x8c   :  { %v331_v43 = vpop.permute.xlu1 %330  ;;  %v320_v44 = vpop.permute.xlu0 %319 }
  0x8d   :  { %vm395_vm1 = vcmp.eq.s32.totalorder %v331_v43, %v1215_v47  ;;  %vm393_vm5 = vcmp.eq.s32.totalorder %v320_v44, %v1215_v47 }
  0x8e   :  { %v929_v52 = vsel %vm395_vm1, 1.0, %v1135_v36  ;;  %v927_v60 = vsel %vm393_vm5, 1.0, %v1135_v36 }
  0x8f   :  { %v457_v59 = vsel %vm201_vm9, %v929_v52, 0.0  ;;  %v448_v9 = vsel %vm201_vm9, %v927_v60, 0.0 }
  0x90   :  { %v335_v45 = vpop.permute.xlu1 %334  ;;  %v324_v46 = vpop.permute.xlu0 %323 }
  0x91   :  { %vm396_vm2 = vcmp.eq.s32.totalorder %v335_v45, %v1215_v47  ;;  %vm394_vm3 = vcmp.eq.s32.totalorder %v324_v46, %v1215_v47 }
  0x92   :  { %v930_v53 = vsel %vm396_vm2, 1.0, %v1135_v36  ;;  %v928_v54 = vsel %vm394_vm3, 1.0, %v1135_v36 }
  0x93   :  { %v458_v61 = vsel %vm201_vm9, %v930_v53, 0.0  ;;  %v449_v0 = vsel %vm201_vm9, %v928_v54, 0.0 }
  0x94   :  { %v313_v48 = vpop.permute.xlu1 %312  ;;  %v309_v49 = vpop.permute.xlu0 %308  ;;  %v459_v10 = vadd.f32 %v458_v61, %v457_v59  ;;  %v450_v13 = vadd.f32 %v449_v0, %v448_v9 }
  0x95   :  { %vm392_vm4 = vcmp.eq.s32.totalorder %v313_v48, %v1215_v47  ;;  %vm391_vm6 = vcmp.eq.s32.totalorder %v309_v49, %v1215_v47 }
  0x96   :  { %v926_v55 = vsel %vm392_vm4, 1.0, %v1135_v36  ;;  %v925_v56 = vsel %vm391_vm6, 1.0, %v1135_v36  ;;  %v460_v22 = vrot.slane %v459_v10, 4  ;;  %v451_v25 = vrot.slane %v450_v13, 4 }
  0x97   :  { %v440_v1 = vsel %vm201_vm9, %v926_v55, 0.0  ;;  %v439_v2 = vsel %vm201_vm9, %v925_v56, 0.0  ;;  %vm547_vm6 = vcmask 1041409  }
  0x98   :  { %v346_v50 = vpop.permute.xlu1 %345  ;;  %v342_v51 = vpop.permute.xlu0 %341  ;;  %v441_v17 = vadd.f32 %v440_v1, %v439_v2  ;;  %v461_v35 = vadd.f32 %v460_v22, %v459_v10  ;;  %v452_v39 = vadd.f32 %v451_v25, %v450_v13  ;;  %v1271_v22 = vld [vmem:[#allocation2 + $0x8] sm:$0xff] }
  0x99   :  { %vm398_vm7 = vcmp.eq.s32.totalorder %v346_v50, %v1215_v47  ;;  %vm397_vm8 = vcmp.eq.s32.totalorder %v342_v51, %v1215_v47 }
  0x9a   :  { %v932_v57 = vsel %vm398_vm7, 1.0, %v1135_v36  ;;  %v931_v58 = vsel %vm397_vm8, 1.0, %v1135_v36  ;;  %v442_v30 = vrot.slane %v441_v17, 4  ;;  %v462_v51 = vrot.slane %v461_v35, 2 }
  0x9b   :  { %v467_v5 = vsel %vm201_vm9, %v932_v57, 0.0  ;;  %v466_v6 = vsel %vm201_vm9, %v931_v58, 0.0  ;;  %v453_v58 = vrot.slane %v452_v39, 2  ;;  %vm550_vm7 = vcmask 1042434  }
  0x9c   :  { %v357_v62 = vpop.permute.xlu1 %356  ;;  %v353_v63 = vpop.permute.xlu0 %352  ;;  %v468_v18 = vadd.f32 %v467_v5, %v466_v6  ;;  %v443_v44 = vadd.f32 %v442_v30, %v441_v17  ;;  %vm553_vm8 = vcmask 1043459  }
  0x9d   :  { %vm400_vm10 = vcmp.eq.s32.totalorder %v357_v62, %v1215_v47  ;;  %vm399_vm11 = vcmp.eq.s32.totalorder %v353_v63, %v1215_v47  ;;  %v463_v63 = vadd.f32 %v462_v51, %v461_v35  ;;  %v454_v6 = vadd.f32 %v453_v58, %v452_v39 }
  0x9e   :  { %v934_v7 = vsel %vm400_vm10, 1.0, %v1135_v36  ;;  %v933_v12 = vsel %vm399_vm11, 1.0, %v1135_v36  ;;  %v469_v31 = vrot.slane %v468_v18, 4  ;;  %v444_v59 = vrot.slane %v443_v44, 2 }
  0x9f   :  { %v476_v11 = vsel %vm201_vm9, %v934_v7, 0.0  ;;  %v475_v14 = vsel %vm201_vm9, %v933_v12, 0.0  ;;  %vm556_vm10 = vcmask 1044484  }
  0xa0   :  { %v368_v15 = vpop.permute.xlu1 %367  ;;  %v364_v16 = vpop.permute.xlu0 %363  ;;  %v477_v19 = vadd.f32 %v476_v11, %v475_v14  ;;  %v470_v45 = vadd.f32 %v469_v31, %v468_v18  ;;  %v445_v7 = vadd.f32 %v444_v59, %v443_v44  ;;  %v464_v14 = vrot.slane %v463_v63, 1 }
  0xa1   :  { %vm402_vm12 = vcmp.eq.s32.totalorder %v368_v15, %v1215_v47  ;;  %vm401_vm13 = vcmp.eq.s32.totalorder %v364_v16, %v1215_v47  ;;  %v455_v18 = vrot.slane %v454_v6, 1 }
  0xa2   :  { %v936_v20 = vsel %vm402_vm12, 1.0, %v1135_v36  ;;  %v935_v21 = vsel %vm401_vm13, 1.0, %v1135_v36  ;;  %v478_v32 = vrot.slane %v477_v19, 4  ;;  %v471_v60 = vrot.slane %v470_v45, 2 }
  0xa3   :  { %v485_v23 = vsel %vm201_vm9, %v936_v20, 0.0  ;;  %v484_v24 = vsel %vm201_vm9, %v935_v21, 0.0  ;;  %v1269_v21 = vld [vmem:[#allocation2] sm:$0xff]  ;;  %vm559_vm12 = vcmask 1045509   ;;  %vm562_vm13 = vcmask 1046534  }
  0xa4   :  { %v486_v26 = vadd.f32 %v485_v23, %v484_v24  ;;  %v379_v28 = vpop.permute.xlu1 %378  ;;  %v375_v29 = vpop.permute.xlu0 %374  ;;  %v479_v46 = vadd.f32 %v478_v32, %v477_v19  ;;  %v472_v9 = vadd.f32 %v471_v60, %v470_v45  ;;  %v446_v19 = vrot.slane %v445_v7, 1 }
  0xa5   :  { %vm404_vm14 = vcmp.eq.s32.totalorder %v379_v28, %v1215_v47  ;;  %vm403_vm15 = vcmp.eq.s32.totalorder %v375_v29, %v1215_v47  ;;  %v465_v28 = vadd.f32 %v464_v14, %v463_v63  ;;  %v1062_v32 = vpack.c.bf16 %v1271_v22, %v1269_v21 }
  0xa6   :  { %v938_v33 = vsel %vm404_vm14, 1.0, %v1135_v36  ;;  %v937_v34 = vsel %vm403_vm15, 1.0, %v1135_v36  ;;  %v487_v40 = vrot.slane %v486_v26, 4  ;;  %v480_v61 = vrot.slane %v479_v46, 2 }
  0xa7   :  { %v494_v37 = vsel %vm201_vm9, %v938_v33, 0.0  ;;  %v493_v38 = vsel %vm201_vm9, %v937_v34, 0.0  ;;  %v473_v20 = vrot.slane %v472_v9, 1  ;;  %v456_v33 = vadd.f32 %v455_v18, %v454_v6 }
  0xa8   :  { %v495_v41 = vadd.f32 %v494_v37, %v493_v38  ;;  %v390_v42 = vpop.permute.xlu1 %389  ;;  %v386_v43 = vpop.permute.xlu0 %385  ;;  %v488_v54 = vadd.f32 %v487_v40, %v486_v26  ;;  %v481_v10 = vadd.f32 %v480_v61, %v479_v46  ;;  %v447_v34 = vadd.f32 %v446_v19, %v445_v7 }
  0xa9   :  { %vm406_vm1 = vcmp.eq.s32.totalorder %v390_v42, %v1215_v47  ;;  %vm405_vm2 = vcmp.eq.s32.totalorder %v386_v43, %v1215_v47  ;;  %v474_v35 = vadd.f32 %v473_v20, %v472_v9  ;;  %vm565_vm14 = vcmask 1047559  }
  0xaa   :  { %v496_v48 = vrot.slane %v495_v41, 4  ;;  %v940_v49 = vsel %vm406_vm1, 1.0, %v1135_v36  ;;  %v939_v50 = vsel %vm405_vm2, 1.0, %v1135_v36  ;;  %v489_v0 = vrot.slane %v488_v54, 2 }
  0xab   :  { %v503_v52 = vsel %vm201_vm9, %v940_v49, 0.0  ;;  %v502_v53 = vsel %vm201_vm9, %v939_v50, 0.0  ;;  %v482_v23 = vrot.slane %v481_v10, 1 }
  0xac   :  { %v497_v55 = vadd.f32 %v496_v48, %v495_v41  ;;  %v504_v56 = vadd.f32 %v503_v52, %v502_v53  ;;  %v82_v57 = vpop.permute.xlu1 %81  ;;  %v490_v15 = vadd.f32 %v489_v0, %v488_v54 }
  0xad   :  { %vm155_vm3 = vcmp.eq.s32.totalorder %v82_v57, %v1215_v47  ;;  %v483_v39 = vadd.f32 %v482_v23, %v481_v10 }
  0xae   :  { %v505_v62 = vrot.slane %v504_v56, 4  ;;  %v498_v1 = vrot.slane %v497_v55, 2  ;;  %v910_v12 = vsel %vm155_vm3, 1.0, %v1135_v36  ;;  %v491_v29 = vrot.slane %v490_v15, 1 }
  0xaf   :  { %v211_v24 = vsel %vm201_vm9, %v910_v12, 0.0 }
  0xb0   :  { %v506_v2 = vadd.f32 %v505_v62, %v504_v56  ;;  %v86_v5 = vpop.permute.xlu1 %85  ;;  %v499_v16 = vadd.f32 %v498_v1, %v497_v55  ;;  %v492_v46 = vadd.f32 %v491_v29, %v490_v15 }
  0xb1   :  { %vm156_vm4 = vcmp.eq.s32.totalorder %v86_v5, %v1215_v47 }
  0xb2   :  { %v507_v11 = vrot.slane %v506_v2, 2  ;;  %v911_v13 = vsel %vm156_vm4, 1.0, %v1135_v36  ;;  %v500_v30 = vrot.slane %v499_v16, 1 }
  0xb3   :  { %v212_v25 = vsel %vm201_vm9, %v911_v13, 0.0 }
  0xb4   :  { %v97_v17 = vpop.permute.xlu1 %96  ;;  %v508_v26 = vadd.f32 %v507_v11, %v506_v2  ;;  %v1278_v37 = vadd.f32 %v212_v25, %v211_v24  ;;  %v501_v48 = vadd.f32 %v500_v30, %v499_v16 }
  0xb5   :  { %vm158_vm5 = vcmp.eq.s32.totalorder %v97_v17, %v1215_v47 }
  0xb6   :  { %v913_v42 = vsel %vm158_vm5, 1.0, %v1135_v36  ;;  %v509_v43 = vrot.slane %v508_v26, 1  ;;  %v214_v52 = vrot.slane %v1278_v37, 4 }
  0xb7   :  { %v221_v53 = vsel %vm201_vm9, %v913_v42, 0.0  ;;  %v31_v42 = vld [vmem:[#allocation2 + $0x18] sm:$0xff] }
  0xb8   :  { %v75_v31 = vpop.permute.xlu1 %74  ;;  %v510_v60 = vadd.f32 %v509_v43, %v508_v26  ;;  %v215_v43 = vadd.f32 %v214_v52, %v1278_v37  ;;  %v32_v52 = vld [vmem:[#allocation2 + $0x20] sm:$0xff] }
  0xb9   :  { %v514_v38 = vpop.permute.xlu0 %513  ;;  %vm154_vm11 = vcmp.eq.s32.totalorder %v75_v31, %v1215_v47 }
  0xba   :  { %v515_v40 = vrot.slane %v514_v38, 1  ;;  %v516_v41 = vrot.slane %v514_v38, 2  ;;  %v517_v44 = vrot.slane %v514_v38, 3  ;;  %v518_v45 = vrot.slane %v514_v38, 4 }
  0xbb   :  { %v519_v51 = vrot.slane %v514_v38, 5  ;;  %v520_v55 = vrot.slane %v514_v38, 6  ;;  %v909_v57 = vsel %vm154_vm11, 1.0, %v1135_v36  ;;  %v521_v58 = vrot.slane %v514_v38, 7 }
  0xbc   :  { %v531_v49 = vmul.f32 %v515_v40, %v456_v33  ;;  %v108_v50 = vpop.permute.xlu1 %107  ;;  %v532_v56 = vmul.f32 %v516_v41, %v465_v28  ;;  %v533_v59 = vmul.f32 %v517_v44, %v474_v35  ;;  %v530_v61 = vmul.f32 %v514_v38, %v447_v34  ;;  %v30_v41 = vld [vmem:[#allocation2 + $0x10] sm:$0xff] }
  0xbd   :  { %v93_v54 = vpop.permute.xlu0 %92  ;;  %v534_v63 = vmul.f32 %v518_v45, %v483_v39  ;;  %vm160_vm1 = vcmp.eq.s32.totalorder %v108_v50, %v1215_v47  ;;  %v535_v1 = vmul.f32 %v519_v51, %v492_v46  ;;  %v203_v7 = vsel %vm201_vm9, %v909_v57, 0.0 }
  0xbe   :  { %vm157_vm15 = vcmp.eq.s32.totalorder %v93_v54, %v1215_v47  ;;  %v546_v2 = vrot.slane %v531_v49, 7  ;;  %v536_v10 = vmul.f32 %v520_v55, %v501_v48  ;;  %v549_v11 = vrot.slane %v532_v56, 6  ;;  %v33_v54 = vld [vmem:[#allocation2 + $0x28] sm:$0xff] }
  0xbf   :  { %v912_v62 = vsel %vm157_vm15, 1.0, %v1135_v36  ;;  %v537_v12 = vmul.f32 %v521_v58, %v510_v60  ;;  %v552_v14 = vrot.slane %v533_v59, 5  ;;  %v915_v16 = vsel %vm160_vm1, 1.0, %v1135_v36 }
  0xc0   :  { %v220_v0 = vsel %vm201_vm9, %v912_v62, 0.0  ;;  %v119_v5 = vpop.permute.xlu1 %118  ;;  %v548_v13 = vsel %vm547_vm6, %v546_v2, %v530_v61  ;;  %v555_v18 = vrot.slane %v534_v63, 4  ;;  %v558_v23 = vrot.slane %v535_v1, 3 }
  0xc1   :  { %v222_v6 = vadd.f32 %v221_v53, %v220_v0  ;;  %v71_v9 = vpop.permute.xlu0 %70  ;;  %v551_v17 = vsel %vm550_vm7, %v549_v11, %v548_v13  ;;  %vm162_vm3 = vcmp.eq.s32.totalorder %v119_v5, %v1215_v47  ;;  %v561_v30 = vrot.slane %v536_v10, 2 }
  0xc2   :  { %vm153_vm2 = vcmp.eq.s32.totalorder %v71_v9, %v1215_v47  ;;  %v554_v20 = vsel %vm553_vm8, %v552_v14, %v551_v17  ;;  %v230_v31 = vsel %vm201_vm9, %v915_v16, 0.0  ;;  %v564_v34 = vrot.slane %v537_v12, 1 }
  0xc3   :  { %v908_v15 = vsel %vm153_vm2, 1.0, %v1135_v36  ;;  %v223_v25 = vrot.slane %v222_v6, 4  ;;  %v557_v29 = vsel %vm556_vm10, %v555_v18, %v554_v20  ;;  %v917_v40 = vsel %vm162_vm3, 1.0, %v1135_v36 }
  0xc4   :  { %v202_v19 = vsel %vm201_vm9, %v908_v15, 0.0  ;;  %v130_v24 = vpop.permute.xlu1 %129  ;;  %v560_v33 = vsel %vm559_vm12, %v558_v23, %v557_v29  ;;  %v239_v53 = vsel %vm201_vm9, %v917_v40, 0.0  ;;  %v1065_v37 = vpack.c.bf16 %v31_v42, %v30_v41  ;;  %v34_v23 = vld [vmem:[#allocation2 + $0x30] sm:$0xff] }
  0xc5   :  { %v204_v26 = vadd.f32 %v203_v7, %v202_v19  ;;  %v104_v28 = vpop.permute.xlu0 %103  ;;  %v563_v39 = vsel %vm562_vm13, %v561_v30, %v560_v33  ;;  %vm164_vm5 = vcmp.eq.s32.totalorder %v130_v24, %v1215_v47  ;;  %v224_v48 = vadd.f32 %v223_v25, %v222_v6 }
  0xc6   :  { %vm159_vm4 = vcmp.eq.s32.totalorder %v104_v28, %v1215_v47  ;;  %v566_v45 = vsel %vm565_vm14, %v564_v34, %v563_v39  ;;  %v919_v57 = vsel %vm164_vm5, 1.0, %v1135_v36  ;;  %v216_v58 = vrot.slane %v215_v43, 2 }
  0xc7   :  { %v205_v35 = vrot.slane %v204_v26, 4  ;;  %v914_v38 = vsel %vm159_vm4, 1.0, %v1135_v36  ;;  %993 = vmatmul.mubr.msk.f32.vlgmr.msra.gmra.mrb[0].mxu1 %vm201_vm9, %v566_v45  ;;  %v1068_v62 = vpack.c.bf16 %v33_v54, %v32_v52  ;;  %v248_v0 = vsel %vm201_vm9, %v919_v57, 0.0 }
  0xc8   :  { %v229_v44 = vsel %vm201_vm9, %v914_v38, 0.0  ;;  %v141_v46 = vpop.permute.xlu1 %140  ;;  %1063 = vmatpush3.bf16.msra.mxu1 %v1062_v32  ;;  %1009 = vmatprep.mubr.msk.f32.mxu1 %vm1136_vm0, %v1135_v36  ;;  %v225_v32 = vrot.slane %v224_v48, 2  ;;  %v217_v7 = vadd.f32 %v216_v58, %v215_v43 }
  0xc9   :  { %v231_v49 = vadd.f32 %v230_v31, %v229_v44  ;;  %v115_v50 = vpop.permute.xlu0 %114  ;;  %v206_v51 = vadd.f32 %v205_v35, %v204_v26  ;;  %vm166_vm15 = vcmp.eq.s32.totalorder %v141_v46, %v1215_v47  ;;  %1064 = vmatprep.subr.bf16.mxu1 %v1134_v27 }
  0xca   :  { %vm161_vm11 = vcmp.eq.s32.totalorder %v115_v50, %v1215_v47  ;;  %v921_v1 = vsel %vm166_vm15, 1.0, %v1135_v36  ;;  %v226_v10 = vadd.f32 %v225_v32, %v224_v48  ;;  %v218_v24 = vrot.slane %v217_v7, 1 }
  0xcb   :  { %v232_v55 = vrot.slane %v231_v49, 4  ;;  %v916_v56 = vsel %vm161_vm11, 1.0, %v1135_v36  ;;  %v207_v63 = vrot.slane %v206_v51, 2  ;;  %v257_v15 = vsel %vm201_vm9, %v921_v1, 0.0 }
  0xcc   :  { %v238_v21 = vsel %vm201_vm9, %v916_v56, 0.0  ;;  %v152_v22 = vpop.permute.xlu1 %151  ;;  %1066 = vmatpush3.bf16.msra.mxu1 %v1065_v37  ;;  %v227_v26 = vrot.slane %v226_v10, 1  ;;  %v219_v41 = vadd.f32 %v218_v24, %v217_v7 }
  0xcd   :  { %v233_v59 = vadd.f32 %v232_v55, %v231_v49  ;;  %v240_v60 = vadd.f32 %v239_v53, %v238_v21  ;;  %v126_v61 = vpop.permute.xlu0 %125  ;;  %vm168_vm2 = vcmp.eq.s32.totalorder %v152_v22, %v1215_v47  ;;  %1067 = vmatprep.subr.bf16.mxu1 %v1134_v27  ;;  %v208_v14 = vadd.f32 %v207_v63, %v206_v51 }
  0xce   :  { %vm163_vm1 = vcmp.eq.s32.totalorder %v126_v61, %v1215_v47  ;;  %v923_v16 = vsel %vm168_vm2, 1.0, %v1135_v36  ;;  %v228_v44 = vadd.f32 %v227_v26, %v226_v10 }
  0xcf   :  { %v234_v2 = vrot.slane %v233_v59, 2  ;;  %v241_v5 = vrot.slane %v240_v60, 4  ;;  %v918_v6 = vsel %vm163_vm1, 1.0, %v1135_v36  ;;  %v209_v33 = vrot.slane %v208_v14, 1 }
  0xd0   :  { %v247_v9 = vsel %vm201_vm9, %v918_v6, 0.0  ;;  %1069 = vmatpush3.bf16.msra.mxu1 %v1068_v62  ;;  %v266_v34 = vsel %vm201_vm9, %v923_v16, 0.0 }
  0xd1   :  { %v242_v11 = vadd.f32 %v241_v5, %v240_v60  ;;  %v249_v12 = vadd.f32 %v248_v0, %v247_v9  ;;  %v137_v13 = vpop.permute.xlu0 %136  ;;  %v235_v17 = vadd.f32 %v234_v2, %v233_v59  ;;  %1007 = vmatprep.subr.mxu1 %v1135_v36  ;;  %v210_v50 = vadd.f32 %v209_v33, %v208_v14  ;;  %v43_v33 = vld [vmem:[#allocation2 + $0x78] sm:$0xff] }
  0xd2   :  { %vm165_vm3 = vcmp.eq.s32.totalorder %v137_v13, %v1215_v47 }
  0xd3   :  { %v243_v18 = vrot.slane %v242_v11, 2  ;;  %v250_v19 = vrot.slane %v249_v12, 4  ;;  %v920_v20 = vsel %vm165_vm3, 1.0, %v1135_v36  ;;  %v236_v35 = vrot.slane %v235_v17, 1 }
  0xd4   :  { %v256_v25 = vsel %vm201_vm9, %v920_v20, 0.0  ;;  %1008 = vmatpush3.msra.mxu1 %v34_v23 }
  0xd5   :  { %v244_v28 = vadd.f32 %v243_v18, %v242_v11  ;;  %v251_v29 = vadd.f32 %v250_v19, %v249_v12  ;;  %v258_v30 = vadd.f32 %v257_v15, %v256_v25  ;;  %v148_v31 = vpop.permute.xlu0 %147  ;;  %1047 = vmatprep.subr.mxu1 %v1135_v36  ;;  %v237_v37 = vadd.f32 %v236_v35, %v235_v17 }
  0xd6   :  { %vm167_vm4 = vcmp.eq.s32.totalorder %v148_v31, %v1215_v47  ;;  %v42_v31 = vld [vmem:[#allocation2 + $0x70] sm:$0xff] }
  0xd7   :  { %v252_v38 = vrot.slane %v251_v29, 2  ;;  %v259_v39 = vrot.slane %v258_v30, 4  ;;  %v922_v40 = vsel %vm167_vm4, 1.0, %v1135_v36  ;;  %v245_v42 = vrot.slane %v244_v28, 1 }
  0xd8   :  { %v265_v43 = vsel %vm201_vm9, %v922_v40, 0.0  ;;  %v1071_v35 = vpack.c.bf16 %v43_v33, %v42_v31  ;;  %v46_v40 = vld [vmem:[#allocation2 + $0x90] sm:$0xff] }
  0xd9   :  { %v253_v45 = vadd.f32 %v252_v38, %v251_v29  ;;  %v260_v46 = vadd.f32 %v259_v39, %v258_v30  ;;  %v267_v48 = vadd.f32 %v266_v34, %v265_v43  ;;  %v277_v49 = vpop.permute.xlu0 %276  ;;  %v246_v56 = vadd.f32 %v245_v42, %v244_v28  ;;  %v44_v34 = vld [vmem:[#allocation2 + $0x80] sm:$0xff]  ;;  %v45_v38 = vld [vmem:[#allocation2 + $0x88] sm:$0xff] }
  0xda   :  { %v278_v51 = vrot.slane %v277_v49, 1  ;;  %v279_v47 = vrot.slane %v277_v49, 2  ;;  %v280_v53 = vrot.slane %v277_v49, 3  ;;  %v281_v21 = vrot.slane %v277_v49, 4  ;;  %1072 = vmatpush3.bf16.msra.mxu0 %v1071_v35  ;;  %v48_v43 = vld [vmem:[#allocation2 + $0xa0] sm:$0xff] }
  0xdb   :  { %v254_v52 = vrot.slane %v253_v45, 1  ;;  %v261_v54 = vrot.slane %v260_v46, 2  ;;  %v268_v55 = vrot.slane %v267_v48, 4  ;;  %v293_v60 = vmul.f32 %v277_v49, %v210_v50  ;;  %1073 = vmatprep.subr.bf16.mxu0 %v1134_v27  ;;  %v53_v50 = vld [vmem:[#allocation2 + $0xc8] sm:$0xff] }
  0xdc   :  { %v294_v57 = vmul.f32 %v278_v51, %v219_v41  ;;  %v295_v58 = vmul.f32 %v279_v47, %v228_v44  ;;  %v282_v62 = vrot.slane %v277_v49, 5  ;;  %v296_v63 = vmul.f32 %v280_v53, %v237_v37  ;;  %v47_v41 = vld [vmem:[#allocation2 + $0x98] sm:$0xff]  ;;  %v49_v44 = vld [vmem:[#allocation2 + $0xa8] sm:$0xff]  ;;  %v54_v47 = vld [vmem:[#allocation2 + $0xd0] sm:$0xff] }
  0xdd   :  { %v255_v22 = vadd.f32 %v254_v52, %v253_v45  ;;  %v262_v32 = vadd.f32 %v261_v54, %v260_v46  ;;  %v269_v59 = vadd.f32 %v268_v55, %v267_v48  ;;  %v283_v5 = vrot.slane %v277_v49, 6  ;;  %v51_v46 = vld [vmem:[#allocation2 + $0xb8] sm:$0xff]  ;;  %v56_v52 = vld [vmem:[#allocation2 + $0xe0] sm:$0xff]  ;;  %v57_v54 = vld [vmem:[#allocation2 + $0xe8] sm:$0xff] }
  0xde   :  { %v647_v61 = vrot.slane %v294_v57, 7  ;;  %v649_v0 = vrot.slane %v295_v58, 6  ;;  %v297_v6 = vmul.f32 %v281_v21, %v246_v56  ;;  %v651_v13 = vrot.slane %v296_v63, 5  ;;  %v55_v53 = vld [vmem:[#allocation2 + $0xd8] sm:$0xff]  ;;  %v58_v58 = vld [vmem:[#allocation2 + $0xf0] sm:$0xff] }
  0xdf   :  { %v263_v1 = vrot.slane %v262_v32, 1  ;;  %v270_v2 = vrot.slane %v269_v59, 2  ;;  %v298_v7 = vmul.f32 %v282_v62, %v255_v22  ;;  %v284_v19 = vrot.slane %v277_v49, 7  ;;  %v52_v49 = vld [vmem:[#allocation2 + $0xc0] sm:$0xff]  ;;  %v59_v62 = vld [vmem:[#allocation2 + $0xf8] sm:$0xff] }
  0xe0   :  { %v648_v9 = vsel %vm547_vm6, %v647_v61, %v293_v60  ;;  %v653_v17 = vrot.slane %v297_v6, 4  ;;  %v1074_v39 = vpack.c.bf16 %v45_v38, %v44_v34  ;;  %v1077_v42 = vpack.c.bf16 %v47_v41, %v46_v40 }
  0xe1   :  { %v264_v10 = vadd.f32 %v263_v1, %v262_v32  ;;  %v271_v11 = vadd.f32 %v270_v2, %v269_v59  ;;  %v650_v12 = vsel %vm550_vm7, %v649_v0, %v648_v9  ;;  %v655_v20 = vrot.slane %v298_v7, 3 }
  0xe2   :  { %v652_v16 = vsel %vm553_vm8, %v651_v13, %v650_v12  ;;  %1075 = vmatpush3.bf16.msra.mxu0 %v1074_v39  ;;  %v1080_v45 = vpack.c.bf16 %v49_v44, %v48_v43  ;;  %v1086_v51 = vpack.c.bf16 %v53_v50, %v52_v49  ;;  %v1089_v37 = vpack.c.bf16 %v55_v53, %v54_v47 }
  0xe3   :  { %v272_v14 = vrot.slane %v271_v11, 1  ;;  %v299_v15 = vmul.f32 %v283_v5, %v264_v10  ;;  %v654_v23 = vsel %vm556_vm10, %v653_v17, %v652_v16  ;;  %1076 = vmatprep.subr.bf16.mxu0 %v1134_v27  ;;  %v1092_v55 = vpack.c.bf16 %v57_v54, %v56_v52 }
  0xe4   :  { %v656_v26 = vsel %vm559_vm12, %v655_v20, %v654_v23  ;;  %v736_v21 = vrot.slane %v58_v58, %v1184_v8  ;;  %v742_v63 = vrot.slane %v58_v58, %v1176_v4  ;;  %v887_v5 = vrot.slane %v58_v58, %v1173_v3 }
  0xe5   :  { %v273_v18 = vadd.f32 %v272_v14, %v271_v11  ;;  %v657_v24 = vrot.slane %v299_v15, 2 }
  0xe6   :  { %1078 = vmatpush3.bf16.msra.mxu0 %v1077_v42 }
  0xe7   :  { %v300_v25 = vmul.f32 %v284_v19, %v273_v18  ;;  %v658_v29 = vsel %vm562_vm13, %v657_v24, %v656_v26  ;;  %1079 = vmatprep.subr.bf16.mxu0 %v1134_v27 }
  0xe9   :  { %v659_v28 = vrot.slane %v300_v25, 1 }
  0xea   :  { %1081 = vmatpush3.bf16.msra.mxu0 %v1080_v45 }
  0xeb   :  { %v660_v30 = vsel %vm565_vm14, %v659_v28, %v658_v29  ;;  %1082 = vmatprep.subr.bf16.mxu0 %v1134_v27 }
  0xec   :  { %1010 = vmatmul.mubr.msk.f32.vlgmr.msra.gmra.mrb[2].mxu1 %vm201_vm9, %v660_v30 }
  0xed   :  { %1049 = vmatprep.mubr.msk.f32.mxu1 %vm1136_vm0, %v1135_v36  ;;  %v50_v36 = vld [vmem:[#allocation2 + $0xb0] sm:$0xff]  ;;  %1048 = vmatpush3.xpose.msra.mxu1 %v59_v62  ;;  %vm889_vm0 = vcmask 23552  }
  0xee   :  { %v1083_v48 = vpack.c.bf16 %v51_v46, %v50_v36 }
  0xf0   :  { %1084 = vmatpush3.bf16.msra.mxu0 %v1083_v48 }
  0xf1   :  { %1085 = vmatprep.subr.bf16.mxu0 %v1134_v27 }
  0xf4   :  { %1087 = vmatpush3.bf16.msra.mxu0 %v1086_v51 }
  0xf5   :  { %1088 = vmatprep.subr.bf16.mxu0 %v1134_v27 }
  0xf8   :  { %1090 = vmatpush3.bf16.msra.mxu0 %v1089_v37 }
  0xf9   :  { %1091 = vmatprep.subr.bf16.mxu0 %v1134_v27 }
  0xfc   :  { %1093 = vmatpush3.bf16.msra.mxu0 %v1092_v55 }
 0x19a   :  { %v635_v56 = vpop.f32.mrb[0].mxu1 }
 0x19b   :  { %v994_v57 = vpop.f32.mrb[1].mxu1 }
 0x1bf   :  { %v729_v22 = vpop.f32.mrb[2].mxu1 }
 0x1c0   :  { %v730_v32 = vadd.f32 %v729_v22, %v635_v56  ;;  %v1011_v59 = vpop.f32.mrb[3].mxu1 }
 0x1c2   :  { %v737_v60 = vadd.f32 %v736_v21, %v730_v32 }
 0x1c4   :  { %v738_v61 = vmax.f32 %v737_v60, 0.0 }
 0x1c6   :  { %1045 = vmatmul.mubr.f32.vlgmr.msra.gmra.mrb[0].mxu0 %v738_v61 }
 0x299   :  { %v809_v0 = vpop.f32.mrb[0].mxu0 }
 0x29a   :  { %v810_v1 = vadd.f32 %v809_v0, %v742_v63  ;;  %v1046_v27 = vpop.f32.mrb[1].mxu0 }
 0x29c   :  { %v813_v2 = vmax.f32 %v810_v1, 0.0 }
 0x29e   :  { %1050 = vmatmul.mubr.f32.vlgmr.msra.gmra.mrb[4].mxu1 %v813_v2 }
 0x371   :  { %v880_v6 = vpop.f32.mrb[4].mxu1 }
 0x372   :  { %v888_v8 = vadd.f32 %v887_v5, %v880_v6  ;;  %v1051_v7 = vpop.f32.mrb[5].mxu1 }
 0x374   :  { %v890_v9 = vsel %vm889_vm0, %v888_v8, -inf }
 0x375   :  { %891 = vmax.xlane.f32.xlu1 %v890_v9 }
 0x402   :  { %v892_v10 = vpop.xlane.xlu1 %891 }
 0x403   :  { %v893_v11 = vsub.f32 %v888_v8, %v892_v10 }
 0x405   :  { %v894_v12 = vmul.f32 1.442695, %v893_v11 }
 0x407   :  { %1102 = vpow2.f32 %v894_v12 }
 0x411   :  { %v1103_v13 = vpop.eup %1102 }
 0x412   :  { %v896_v4 = vsel %vm889_vm0, %v1103_v13, 0.0 }
 0x413   :  { %897 = vadd.xlane.f32.xlu0 %v896_v4 }
 0x4a0   :  { %v898_v14 = vpop.xlane.xlu0 %897 }
 0x4a1   :  { %1104 = vlog2.f32 %v898_v14 }
 0x4ab   :  { %v1105_v15 = vpop.eup %1104 }
 0x4ac   :  { %v900_v16 = vmul.f32 0.6931472, %v1105_v15 }
 0x4ae   :  { %v901_v3 = vsub.f32 %v893_v11, %v900_v16 }
 0x4b0   :  { %902 = vst.msk [vmem:[%s1375_s3] sm:$0xff] %vm889_vm0, %v901_v3 }
 0x4b1   :  { %907 = vsyncpa [#allocation3], 1 }

</bundles_post_ra>
